<compile_context>
chip_gen: v7x
topology: tpu7x:2x2x1
jax: 0.10.0
libtpu: 0.0.40
codegen_flags: <defaults>
</compile_context>

<pallas_src>
import functools

import jax
import jax.numpy as jnp
from jax.experimental import pallas as pl
from jax.experimental.pallas import tpu as pltpu


def _mrl_kernel_unweighted(p_ref, n_ref, scores_ref, psum_ref, *, margin):
    # p_ref: (1, tc)   n_ref / scores_ref: (num_nce, tc)   psum_ref: (1, 1) SMEM
    p = p_ref[...].astype(jnp.float32)          # sublane-broadcasts against n
    n = n_ref[...].astype(jnp.float32)
    scores = jnp.maximum(margin + p - n, 0.0)
    scores_ref[...] = scores.astype(scores_ref.dtype)
    psum_ref[0, 0] = jnp.sum(scores)


def _mrl_kernel_weighted(inv_wm_ref, p_ref, n_ref, w_ref, scores_ref, psum_ref,
                         *, margin):
    # inv_wm_ref: (1,) SMEM scalar holding 1 / weights.mean()
    p = p_ref[...].astype(jnp.float32)
    n = n_ref[...].astype(jnp.float32)
    w = w_ref[...].astype(jnp.float32)
    scores = jnp.maximum(margin + p - n, 0.0) * (w * inv_wm_ref[0])
    scores_ref[...] = scores.astype(scores_ref.dtype)
    psum_ref[0, 0] = jnp.sum(scores)


def _round_up(x, m):
    return -(-x // m) * m


def _plan_tiling(num_cols, num_rows, elem_bytes, target_bytes):
    """Pick (tc, padded_cols): lane-tile size and padded lane extent.

    tc is a multiple of 128 (or the full extent for tiny arrays), divides
    padded_cols, keeps a sublane-padded (num_rows, tc) block under
    `target_bytes`, and yields >= 2 tiles whenever the lane extent spans
    >= 2 lane tiles (so both of v7x's TensorCores get work).
    """
    rows_pad = _round_up(max(num_rows, 1), 8)           # real sublane footprint
    cap = max(128, (target_bytes // (rows_pad * elem_bytes)) // 128 * 128)

    if num_cols <= 128:
        return num_cols, num_cols                       # one full-extent block

    # Prefer an exact multiple-of-128 divisor of B (no padding), >= 2 tiles.
    upper = min(cap, num_cols // 2 if num_cols >= 256 else num_cols)
    tc = max(128, (upper // 128) * 128)
    while tc >= 128:
        if num_cols % tc == 0:
            return tc, num_cols
        tc -= 128

    # Fallback: pad the lane extent up to a multiple of a 128-aligned tile.
    cols128 = _round_up(num_cols, 128)
    half = max(128, ((cols128 // 2) // 128) * 128) if cols128 >= 256 else cols128
    tc = min(cap, half)
    return tc, _round_up(num_cols, tc)


def margin_ranking_loss(p_enrgs, n_enrgs, weights=None, *, margin, num_nce,
                        weights_mean=None, target_block_bytes=4 << 20):
    """Returns (scores.mean(), scores) exactly like the torch module."""
    p_enrgs = jnp.asarray(p_enrgs)
    n_enrgs = jnp.asarray(n_enrgs)
    B = p_enrgs.shape[0]
    N = n_enrgs.shape[0]
    assert N == B * num_nce, "n_enrgs must have length B * num_nce"

    out_dtype = jnp.result_type(p_enrgs.dtype, n_enrgs.dtype)
    if weights is not None:
        weights = jnp.asarray(weights)
        out_dtype = jnp.result_type(out_dtype, weights.dtype)
    elem_bytes = max(
        jnp.dtype(p_enrgs.dtype).itemsize,
        jnp.dtype(n_enrgs.dtype).itemsize,
        jnp.dtype(out_dtype).itemsize,
        jnp.dtype(weights.dtype).itemsize if weights is not None else 0,
    )

    tc, B_pad = _plan_tiling(B, num_nce, elem_bytes, target_block_bytes)
    num_tiles = B_pad // tc
    pad = B_pad - B

    # Lane-dense layout: row r of the (num_nce, B) slab is the r-th repeat.
    p2 = p_enrgs.reshape(1, B)
    n2 = n_enrgs.reshape(num_nce, B)
    if pad:
        # Pad p with 0 and n with +inf so padded scores clamp to exactly 0,
        # leaving per-tile partial sums (and hence the mean) untouched.
        p2 = jnp.pad(p2, ((0, 0), (0, pad)))
        n2 = jnp.pad(n2, ((0, 0), (0, pad)), constant_values=float("inf"))

    p_spec = pl.BlockSpec((1, tc), lambda i: (0, i))
    row_spec = pl.BlockSpec((num_nce, tc), lambda i: (0, i))
    psum_spec = pl.BlockSpec((1, 1), lambda i: (i, 0),
                             memory_space=pltpu.MemorySpace.SMEM)
    out_shape = (
        jax.ShapeDtypeStruct((num_nce, B_pad), out_dtype),
        jax.ShapeDtypeStruct((num_tiles, 1), jnp.float32),
    )
    compiler_params = pltpu.CompilerParams(
        dimension_semantics=("parallel",),
        vmem_limit_bytes=48 * 1024 * 1024,
    )

    if weights is None:
        kernel = functools.partial(_mrl_kernel_unweighted, margin=float(margin))
        scores2, psums = pl.pallas_call(
            kernel,
            out_shape=out_shape,
            grid=(num_tiles,),
            in_specs=[p_spec, row_spec],
            out_specs=(row_spec, psum_spec),
            compiler_params=compiler_params,
        )(p2, n2)
    else:
        w2 = weights.reshape(num_nce, B)
        if pad:
            w2 = jnp.pad(w2, ((0, 0), (0, pad)))   # zero weights on padding
        if weights_mean is None:
            weights_mean = jnp.mean(weights.astype(jnp.float32))
        inv_wm = (1.0 / jnp.asarray(weights_mean, jnp.float32)).reshape(1)
        kernel = functools.partial(_mrl_kernel_weighted, margin=float(margin))
        scores2, psums = pl.pallas_call(
            kernel,
            out_shape=out_shape,
            grid=(num_tiles,),
            in_specs=[
                pl.BlockSpec(memory_space=pltpu.MemorySpace.SMEM),  # 1/mean(w)
                p_spec,
                row_spec,
                row_spec,
            ],
            out_specs=(row_spec, psum_spec),
            compiler_params=compiler_params,
        )(inv_wm, p2, n2, w2)

    mean = (jnp.sum(psums) / N).astype(out_dtype)
    scores = scores2[:, :B].reshape(N) if pad else scores2.reshape(N)
    return mean, scores


def _reference(p, n, w, margin, num_nce):
    scores = jnp.maximum(margin + jnp.tile(p, num_nce) - n, 0.0)
    if w is not None:
        scores = scores * w / jnp.mean(w)
    return jnp.mean(scores), scores


if __name__ == "__main__":
    key = jax.random.PRNGKey(0)
    k1, k2, k3, k4, k5, k6 = jax.random.split(key, 6)

    margin = 1.0
    num_nce = 4

    # --- Small case: single full-extent tile (B <= 128). ---
    B = 8
    N = B * num_nce
    p_a = jax.random.normal(k1, (B,), jnp.float32)
    n_a = jax.random.normal(k2, (N,), jnp.float32)
    w_a = jax.random.uniform(k3, (N,), jnp.float32, minval=0.5, maxval=1.5)

    mean_u, scores_u = margin_ranking_loss(
        p_a, n_a, None, margin=margin, num_nce=num_nce)
    jax.block_until_ready((mean_u, scores_u))
    ref_mean, ref_scores = _reference(p_a, n_a, None, margin, num_nce)
    assert jnp.allclose(scores_u, ref_scores, atol=1e-5)
    assert jnp.allclose(mean_u, ref_mean, atol=1e-5)

    mean_w, scores_w = margin_ranking_loss(
        p_a, n_a, w_a, margin=margin, num_nce=num_nce)
    jax.block_until_ready((mean_w, scores_w))
    ref_mean, ref_scores = _reference(p_a, n_a, w_a, margin, num_nce)
    assert jnp.allclose(scores_w, ref_scores, atol=1e-5)
    assert jnp.allclose(mean_w, ref_mean, atol=1e-5)

    # --- Padded-lane fallback: B not a multiple of 128 -> pad + 2 tiles. ---
    B2 = 200
    N2 = B2 * num_nce
    p_b = jax.random.normal(k4, (B2,), jnp.float32)
    n_b = jax.random.normal(k5, (N2,), jnp.float32)
    w_b = jax.random.uniform(k6, (N2,), jnp.float32, minval=0.5, maxval=1.5)

    mean_p, scores_p = margin_ranking_loss(
        p_b, n_b, w_b, margin=margin, num_nce=num_nce)
    jax.block_until_ready((mean_p, scores_p))
    ref_mean, ref_scores = _reference(p_b, n_b, w_b, margin, num_nce)
    assert jnp.allclose(scores_p, ref_scores, atol=1e-5)
    assert jnp.allclose(mean_p, ref_mean, atol=1e-5)

    print("KERNEL_OK")
</pallas_src>

<mosaic_0001>
module attributes {stable_mosaic.version = 11 : i64} {
  func.func @_mrl_kernel_unweighted(%arg0: i32, %arg1: memref<1x8xf32, #tpu.memory_space<vmem>>, %arg2: memref<4x8xf32, #tpu.memory_space<vmem>>, %arg3: memref<4x8xf32, #tpu.memory_space<vmem>>, %arg4: memref<1x1xf32, #tpu.memory_space<smem>>) attributes {dimension_semantics = [#tpu.dimension_semantics<parallel>], iteration_bounds = array<i64: 1>, scalar_prefetch = 0 : i64, scratch_operands = 0 : i64, tpu.core_type = #tpu.core_type<tc>, window_params = [{transform_indices = @transform_0, window_bounds = array<i64: 1, 8>}, {transform_indices = @transform_1, window_bounds = array<i64: 4, 8>}, {transform_indices = @transform_2, window_bounds = array<i64: 4, 8>}, {transform_indices = @transform_3, window_bounds = array<i64: 1, 1>}]} {
    %c0 = arith.constant 0 : index
    %c0_0 = arith.constant 0 : index
    %0 = vector.load %arg1[%c0, %c0_0] : memref<1x8xf32, #tpu.memory_space<vmem>>, vector<1x8xf32>
    %c0_1 = arith.constant 0 : index
    %c0_2 = arith.constant 0 : index
    %1 = vector.load %arg2[%c0_1, %c0_2] : memref<4x8xf32, #tpu.memory_space<vmem>>, vector<4x8xf32>
    %cst = arith.constant 1.000000e+00 : f32
    %2 = vector.broadcast %cst : f32 to vector<1x8xf32>
    %3 = arith.addf %2, %0 : vector<1x8xf32>
    %4 = vector.broadcast %3 : vector<1x8xf32> to vector<4x8xf32>
    %5 = arith.subf %4, %1 : vector<4x8xf32>
    %cst_3 = arith.constant 0.000000e+00 : f32
    %6 = vector.broadcast %cst_3 : f32 to vector<4x8xf32>
    %7 = arith.maximumf %5, %6 : vector<4x8xf32>
    %c0_4 = arith.constant 0 : index
    %c0_5 = arith.constant 0 : index
    %8 = vector.load %arg3[%c0_4, %c0_5] : memref<4x8xf32, #tpu.memory_space<vmem>>, vector<4x8xf32>
    tpu.vector_store %arg3[%c0_4, %c0_5], %7 {strides = array<i32>} : memref<4x8xf32, #tpu.memory_space<vmem>>, vector<4x8xf32>,
    %9 = vector.shape_cast %7 : vector<4x8xf32> to vector<1x4x8xf32>
    %cst_6 = arith.constant dense<0.000000e+00> : vector<1xf32>
    %10 = vector.multi_reduction <add>, %9, %cst_6 [1, 2] : vector<1x4x8xf32> to vector<1xf32>
    %11 = vector.shape_cast %10 : vector<1xf32> to vector<1x1x1xf32>
    %12 = vector.extract %11[0, 0, 0] : f32 from vector<1x1x1xf32>
    %c0_7 = arith.constant 0 : index
    %c0_8 = arith.constant 0 : index
    %13 = memref.load %arg4[%c0_7, %c0_8] : memref<1x1xf32, #tpu.memory_space<smem>>
    memref.store %12, %arg4[%c0_7, %c0_8] : memref<1x1xf32, #tpu.memory_space<smem>>
    return
  }
  func.func @transform_0(%arg0: i32) -> (i32, i32) {
    %c0_i32 = arith.constant 0 : i32
    %c0_i32_0 = arith.constant 0 : i32
    return %c0_i32, %arg0 : i32, i32
  }
  func.func @transform_1(%arg0: i32) -> (i32, i32) {
    %c0_i32 = arith.constant 0 : i32
    %c0_i32_0 = arith.constant 0 : i32
    return %c0_i32, %arg0 : i32, i32
  }
  func.func @transform_2(%arg0: i32) -> (i32, i32) {
    %c0_i32 = arith.constant 0 : i32
    %c0_i32_0 = arith.constant 0 : i32
    return %c0_i32, %arg0 : i32, i32
  }
  func.func @transform_3(%arg0: i32) -> (i32, i32) {
    %c0_i32 = arith.constant 0 : i32
    %c0_i32_0 = arith.constant 0 : i32
    return %arg0, %c0_i32 : i32, i32
  }
}

</mosaic_0001>

<bundles_post_ra>
// kernel: tpu_custom_call.1
= control target key start
LH: loop header
LB: loop body
LE: loop exit
PB: predicated region body
PF: predicated region fallthrough
CT: control target
= control target key end

     0   :  { %9 = vsyncpa [#allocation3], 0  ;;  %s255_s0 = inlined_call_operand.hbm [shape: f32[1,8], index: 0, kind: input, shape index: {}]   ;;  %s256_s1 = inlined_call_operand.hbm [shape: f32[4,8], index: 1, kind: input, shape index: {}]   ;;  %s257_s2 = inlined_call_operand.hbm [shape: f32[4,8], index: 2, kind: output, shape index: {0}]   ;;  %s258_s3 = inlined_call_operand.hbm [shape: f32[1,1], index: 3, kind: output, shape index: {1}]  }
   0x1   :  { %10 = vsyncpa [#allocation7], 0 }
   0x2   :  { %11 = vsyncpa [#allocation4], 0 }
   0x3   :  { %12 = vsyncpa [#allocation5], 0  ;;  %s183_s12 = smov [#allocation2]   ;;  %s184_s14 = smov [#allocation6]  }
   0x4   :  { %s19_s13 = sshll.u32 %s183_s12, 4  ;;  %s29_s15 = sshll.u32 %s184_s14, 4  ;;  %s20_s13 = int_to_ptr.vmem [resolvable:$true] %s19_s13  ;;  %s30_s15 = int_to_ptr.vmem [resolvable:$true] %s29_s15 }
   0x5   :  { %s99_s18 = scalar_lea.hbm %s255_s0, 16 }
   0x6   :  { %p100_p0 = scmp.ne.s32.totalorder %s255_s0, %s99_s18  ;;  %p103_p1 = scmp.lt.u32.totalorder %s99_s18, %s255_s0 }
   0x8   :  { %p105_p2 = pnand %p103_p1, %p100_p0 }
   0xa   :  { %108 = shalt.err (!%p105_p2)
}
   0xb   :  { %s109_s23 = scalar_lea.vmem %s20_s13, 16  ;;  %s113_s24 = scalar_lea.vmem %s20_s13, 32 }
   0xc   :  { %p110_p3 = scmp.ne.s32.totalorder %s20_s13, %s109_s23  ;;  %p114_p4 = scmp.lt.s32.totalorder %s20_s13, %s20_s13 }
   0xd   :  { %p115_p5 = scmp.lt.s32.totalorder %s113_s24, %s109_s23 }
   0xf   :  { %p116_p6 = por %p115_p5, %p114_p4 }
  0x11   :  { %p117_p7 = pnand %p116_p6, %p110_p3 }
  0x13   :  { %120 = shalt.err (!%p117_p7)
}
  0x14   :  { %22 = dma.hbm_to_vmem [thread:$0]  %s255_s0, 16, %s20_s13, [#allocation3]  }
  0x15   :  { %s121_s29 = scalar_lea.hbm %s256_s1, 64 }
  0x16   :  { %p122_p8 = scmp.ne.s32.totalorder %s256_s1, %s121_s29  ;;  %p125_p9 = scmp.lt.u32.totalorder %s121_s29, %s256_s1 }
  0x18   :  { %p127_p10 = pnand %p125_p9, %p122_p8 }
  0x1a   :  { %130 = shalt.err (!%p127_p10)
}
  0x1b   :  { %s131_s7 = scalar_lea.vmem %s30_s15, 64  ;;  %p136_p12 = scmp.lt.s32.totalorder %s30_s15, %s30_s15 }
  0x1c   :  { %p132_p11 = scmp.ne.s32.totalorder %s30_s15, %s131_s7  ;;  %p137_p13 = scmp.lt.s32.totalorder %s131_s7, %s131_s7 }
  0x1e   :  { %p138_p0 = por %p137_p13, %p136_p12 }
  0x20   :  { %p139_p1 = pnand %p138_p0, %p132_p11 }
  0x22   :  { %142 = shalt.err (!%p139_p1)
}
  0x23   :  { %32 = dma.hbm_to_vmem [thread:$0]  %s256_s1, 64, %s30_s15, [#allocation7]  }
  0x24   :  { %175 = dma.done.wait [#allocation3], 16  }
  0x25   :  { %176 = vsyncadd [#allocation3], 4294967280 }
  0x26   :  { %177 = dma.done.wait [#allocation7], 64  }
  0x27   :  { %178 = vsyncadd [#allocation7], 4294967232  ;;  %v43_v0 = vlaneseq  ;;  %v39_v3 = vld [vmem:[#allocation2] sm:$0x1]  ;;  %v40_v5 = vld [vmem:[#allocation6] sm:$0xf] }
  0x28   :  { %v41_v4 = vadd.f32 1.0, %v39_v3  ;;  %vm50_vm0 = vcmask 60416   ;;  %s185_s9 = smov [#allocation8]  }
  0x29   :  { %v44_v1 = vshrl.u32 %v43_v0, 7  ;;  %s70_s10 = sshll.u32 %s185_s9, 4  ;;  %s71_s10 = int_to_ptr.vmem [resolvable:$true] %s70_s10 }
  0x2a   :  { %s143_s1 = scalar_lea.vmem %s71_s10, 64  ;;  %p148_p3 = scmp.lt.s32.totalorder %s71_s10, %s71_s10 }
  0x2b   :  { %v45_v2 = vsub.s32 0, %v44_v1  ;;  %p144_p2 = scmp.ne.s32.totalorder %s71_s10, %s143_s1  ;;  %p149_p4 = scmp.lt.s32.totalorder %s143_s1, %s143_s1 }
  0x2d   :  { %v46_v6 = vrot.slane %v41_v4, %v45_v2  ;;  %p150_p5 = por %p149_p4, %p148_p3 }
  0x2f   :  { %v48_v7 = vsub.f32 %v46_v6, %v40_v5  ;;  %p151_p6 = pnand %p150_p5, %p144_p2 }
  0x31   :  { %v49_v8 = vmax.f32 %v48_v7, 0.0 }
  0x33   :  { %v52_v9 = vsel %vm50_vm0, %v49_v8, 0.0  ;;  %51 = vst.msk [vmem:[#allocation8] sm:$0xf] %vm50_vm0, %v49_v8 }
  0x34   :  { %53 = vadd.xlane.f32.xlu0 %v52_v9 }
  0x35   :  { %154 = shalt.err (!%p151_p6)
}
  0x36   :  { %s155_s13 = scalar_lea.hbm %s257_s2, 64 }
  0x37   :  { %p156_p7 = scmp.ne.s32.totalorder %s257_s2, %s155_s13  ;;  %p159_p8 = scmp.lt.u32.totalorder %s155_s13, %s257_s2 }
  0x39   :  { %p161_p9 = pnand %p159_p8, %p156_p7 }
  0x3b   :  { %164 = shalt.err (!%p161_p9)
}
  0x3c   :  { %73 = dma.vmem_to_hbm [thread:$0]  %s71_s10, 64, %s257_s2, [#allocation4]  }
  0x3d   :  { %s165_s23 = scalar_lea.hbm %s258_s3, 16 }
  0x3e   :  { %p166_p10 = scmp.ne.s32.totalorder %s258_s3, %s165_s23  ;;  %p169_p11 = scmp.lt.u32.totalorder %s165_s23, %s258_s3 }
  0x40   :  { %p171_p12 = pnand %p169_p11, %p166_p10 }
  0xc1   :  { %v54_v10 = vpop.xlane.xlu0 %53 }
  0xc2   :  { %v55_v11 = vrot.slane %v54_v10, 4 }
  0xc4   :  { %v56_v12 = vadd.f32 %v55_v11, %v54_v10 }
  0xc6   :  { %v57_v13 = vrot.slane %v56_v12, 2 }
  0xc8   :  { %v58_v14 = vadd.f32 %v57_v13, %v56_v12 }
  0xca   :  { %v59_v15 = vrot.slane %v58_v14, 1 }
  0xcc   :  { %v60_v16 = vadd.f32 %v59_v15, %v58_v14 }
  0xce   :  { %93 = vpush %v60_v16 }
  0xff   :  { %s94_s20 = spop %93 }
 0x100   :  { %63 = sst [smem:[#allocation9]] %s94_s20 }
 0x101   :  { %174 = shalt.err (!%p171_p12)
}
 0x102   :  { %s186_s27 = smov [#allocation9]  }
 0x103   :  { %81 = dma.smem_to_hbm %s186_s27, 16, %s258_s3, [#allocation5]  }
 0x104   :  { %179 = dma.done.wait [#allocation4], 64  }
 0x105   :  { %180 = vsyncadd [#allocation4], 4294967232 }
 0x106   :  { %181 = dma.done.wait [#allocation5], 16  }
 0x107   :  { %182 = vsyncadd [#allocation5], 4294967280 }
 0x108   :  { %88 = sfence }
 0x109   :  { %89 = vsyncpa [#allocation3], 1 }
 0x10a   :  { %90 = vsyncpa [#allocation7], 1 }
 0x10b   :  { %91 = vsyncpa [#allocation4], 1 }
 0x10c   :  { %92 = vsyncpa [#allocation5], 1 }

</bundles_post_ra>
